<compile_context>
chip_gen: v7x
topology: tpu7x:2x2x1
jax: 0.10.0
libtpu: 0.0.40
codegen_flags: <defaults>
</compile_context>

<pallas_src>
import math

import jax
import jax.numpy as jnp
from jax.experimental import pallas as pl
from jax.experimental.pallas import tpu as pltpu


def _copy_kernel(x_ref, o_ref):
    # Pure lane-dense 2-D block copy; no in-kernel reshape / relayout.
    o_ref[...] = x_ref[...]


def _sublane_pack(dtype) -> int:
    """Rows per packed vreg tile for this dtype (8 f32, 16 bf16, 32 int8/fp8)."""
    itemsize = jnp.dtype(dtype).itemsize
    return max(8, 8 * (4 // max(1, itemsize)))


def _choose_slab(total: int, sub: int):
    """Factor `total` as (rows, lanes) with lanes a large multiple of 128.

    First pass additionally requires rows to be a multiple of the dtype's
    sublane packing so every block is a fully packed (sub, 128) tile.
    Returns None if `total` has no multiple-of-128 factor.
    """
    lane_candidates = (16384, 8192, 4096, 2048, 1024, 512, 256, 128)
    for require_packed_rows in (True, False):
        for lanes in lane_candidates:
            if total % lanes:
                continue
            rows = total // lanes
            if require_packed_rows and rows % sub:
                continue
            return rows, lanes
    return None


def _choose_block_rows(rows: int, lanes: int, itemsize: int, sub: int) -> int:
    """MiB-scale block height: <= 8 MiB/block, aim for >= ~8 grid steps."""
    max_block_bytes = 8 * 1024 * 1024  # v7x-safe with default double buffering
    row_bytes = lanes * itemsize
    total_bytes = rows * row_bytes
    target_bytes = min(max_block_bytes, max(sub * row_bytes, total_bytes // 8))
    block_r = max(sub, (target_bytes // row_bytes) // sub * sub)
    if block_r >= rows:
        return rows  # single block along rows; full-dim block is always legal
    return block_r   # multiple of `sub`; cdiv grid masks the trailing tile


def resnet_forward(x: jax.Array) -> jax.Array:
    """Pallas implementation of ResNet.forward: x.view(B, -1)."""
    b = x.shape[0]
    flat = math.prod(x.shape[1:]) if x.ndim > 1 else 1
    out_shape = (b, flat)
    total = b * flat
    if total == 0:
        return x.reshape(out_shape)

    dtype = jnp.dtype(x.dtype)
    itemsize = dtype.itemsize
    sub = _sublane_pack(dtype)

    slab = _choose_slab(total, sub)
    if slab is not None:
        # Primary path: one flat (rows, lanes) slab, lane-dense full-sublane
        # blocks of MiB scale, independent of the batch size.
        rows, lanes = slab
        block_f = lanes
        block_r = _choose_block_rows(rows, lanes, itemsize, sub)
    else:
        # Fallback: element count has no 128-multiple factor. Keep the
        # (B, flat) view with FIXED bounded blocks + cdiv grid (masked trailing
        # tiles) so VMEM stays bounded on every TPU generation.
        rows, lanes = b, flat
        block_r = rows if rows < 8 else 8 * min(rows // 8, 32)       # <= 256 rows
        block_f = lanes if lanes < 128 else 128 * min(lanes // 128, 32)  # <= 4096 lanes

    grid = (pl.cdiv(rows, block_r), pl.cdiv(lanes, block_f))

    # Metadata-only flatten in the wrapper (row-major, identical element order
    # to torch's .view on a contiguous NCHW tensor).
    x2 = x.reshape(rows, lanes)

    out = pl.pallas_call(
        _copy_kernel,
        out_shape=jax.ShapeDtypeStruct((rows, lanes), dtype),
        grid=grid,
        in_specs=[pl.BlockSpec((block_r, block_f), lambda i, j: (i, j))],
        out_specs=pl.BlockSpec((block_r, block_f), lambda i, j: (i, j)),
        compiler_params=pltpu.CompilerParams(
            dimension_semantics=("parallel", "parallel"),
            vmem_limit_bytes=48 * 1024 * 1024,
        ),
    )(x2)

    # Metadata-only view back to the module's (B, flat) output shape.
    return out.reshape(out_shape)


if __name__ == "__main__":
    key = jax.random.PRNGKey(0)
    # Small NCHW input consistent with the module's forward.
    x = jax.random.normal(key, (2, 4, 16, 16), dtype=jnp.float32)

    out = resnet_forward(x)
    jax.block_until_ready(out)

    # Correctness check against the pure-JAX reference of torch's .view(B, -1).
    ref = x.reshape(x.shape[0], -1)
    assert out.shape == ref.shape, (out.shape, ref.shape)
    assert jnp.array_equal(out, ref), "mismatch vs reference flatten"

    print("KERNEL_OK")
</pallas_src>

<mosaic_0001>
module attributes {stable_mosaic.version = 11 : i64} {
  func.func @_copy_kernel(%arg0: i32, %arg1: i32, %arg2: memref<8x256xf32, #tpu.memory_space<vmem>>, %arg3: memref<8x256xf32, #tpu.memory_space<vmem>>) attributes {dimension_semantics = [#tpu.dimension_semantics<parallel>, #tpu.dimension_semantics<parallel>], iteration_bounds = array<i64: 1, 1>, scalar_prefetch = 0 : i64, scratch_operands = 0 : i64, tpu.core_type = #tpu.core_type<tc>, window_params = [{transform_indices = @transform_0, window_bounds = array<i64: 8, 256>}, {transform_indices = @transform_1, window_bounds = array<i64: 8, 256>}]} {
    %c0 = arith.constant 0 : index
    %c0_0 = arith.constant 0 : index
    %0 = vector.load %arg2[%c0, %c0_0] : memref<8x256xf32, #tpu.memory_space<vmem>>, vector<8x256xf32>
    %c0_1 = arith.constant 0 : index
    %c0_2 = arith.constant 0 : index
    %1 = vector.load %arg3[%c0_1, %c0_2] : memref<8x256xf32, #tpu.memory_space<vmem>>, vector<8x256xf32>
    tpu.vector_store %arg3[%c0_1, %c0_2], %0 {strides = array<i32>} : memref<8x256xf32, #tpu.memory_space<vmem>>, vector<8x256xf32>,
    return
  }
  func.func @transform_0(%arg0: i32, %arg1: i32) -> (i32, i32) {
    %c0_i32 = arith.constant 0 : i32
    return %arg0, %arg1 : i32, i32
  }
  func.func @transform_1(%arg0: i32, %arg1: i32) -> (i32, i32) {
    %c0_i32 = arith.constant 0 : i32
    return %arg0, %arg1 : i32, i32
  }
}

</mosaic_0001>

<bundles_post_ra>
// kernel: tpu_custom_call.1
= control target key start
LH: loop header
LB: loop body
LE: loop exit
PB: predicated region body
PF: predicated region fallthrough
CT: control target
= control target key end

     0   :  { %6 = vsyncpa [#allocation3], 0  ;;  %s126_s0 = inlined_call_operand.hbm [shape: f32[8,256], index: 0, kind: input, shape index: {}]   ;;  %s127_s1 = inlined_call_operand.hbm [shape: f32[8,256], index: 1, kind: output, shape index: {}]  }
   0x1   :  { %7 = vsyncpa [#allocation4], 0  ;;  %s90_s6 = smov [#allocation2]   ;;  %s42_s10 = scalar_lea.hbm %s126_s0, 256 }
   0x2   :  { %s14_s7 = sshll.u32 %s90_s6, 4  ;;  %p43_p0 = scmp.ne.s32.totalorder %s126_s0, %s42_s10  ;;  %s15_s7 = int_to_ptr.vmem [resolvable:$true] %s14_s7 }
   0x3   :  { %p46_p1 = scmp.lt.u32.totalorder %s42_s10, %s126_s0 }
   0x5   :  { %p48_p2 = pnand %p46_p1, %p43_p0 }
   0x7   :  { %51 = shalt.err (!%p48_p2)
}
   0x8   :  { %s52_s15 = scalar_lea.vmem %s15_s7, 256  ;;  %p57_p4 = scmp.lt.s32.totalorder %s15_s7, %s15_s7 }
   0x9   :  { %p53_p3 = scmp.ne.s32.totalorder %s15_s7, %s52_s15  ;;  %p58_p5 = scmp.lt.s32.totalorder %s52_s15, %s52_s15 }
   0xb   :  { %p59_p6 = por %p58_p5, %p57_p4 }
   0xd   :  { %p60_p7 = pnand %p59_p6, %p53_p3 }
   0xf   :  { %63 = shalt.err (!%p60_p7)
}
  0x10   :  { %17 = dma.hbm_to_vmem [thread:$0]  %s126_s0, 256, %s15_s7, [#allocation3]  }
  0x11   :  { %86 = dma.done.wait [#allocation3], 256  }
  0x12   :  { %87 = vsyncadd [#allocation3], 4294967040  ;;  %s91_s18 = smov [#allocation5]   ;;  %v21_v0 = vld [vmem:[#allocation2] sm:$0xff]  ;;  %v22_v1 = vld [vmem:[#allocation2 + $0x8] sm:$0xff] }
  0x13   :  { %s31_s19 = sshll.u32 %s91_s18, 4  ;;  %23 = vst [vmem:[#allocation5] sm:$0xff] %v21_v0  ;;  %24 = vst [vmem:[#allocation5 + $0x8] sm:$0xff] %v22_v1  ;;  %s32_s19 = int_to_ptr.vmem [resolvable:$true] %s31_s19 }
  0x14   :  { %s64_s20 = scalar_lea.vmem %s32_s19, 256  ;;  %p69_p9 = scmp.lt.s32.totalorder %s32_s19, %s32_s19 }
  0x15   :  { %p65_p8 = scmp.ne.s32.totalorder %s32_s19, %s64_s20  ;;  %p70_p10 = scmp.lt.s32.totalorder %s64_s20, %s64_s20 }
  0x17   :  { %p71_p11 = por %p70_p10, %p69_p9 }
  0x19   :  { %p72_p12 = pnand %p71_p11, %p65_p8 }
  0x1b   :  { %75 = shalt.err (!%p72_p12)
}
  0x1c   :  { %s76_s0 = scalar_lea.hbm %s127_s1, 256 }
  0x1d   :  { %p77_p13 = scmp.ne.s32.totalorder %s127_s1, %s76_s0  ;;  %p80_p0 = scmp.lt.u32.totalorder %s76_s0, %s127_s1 }
  0x1f   :  { %p82_p1 = pnand %p80_p0, %p77_p13 }
  0x21   :  { %85 = shalt.err (!%p82_p1)
}
  0x22   :  { %34 = dma.vmem_to_hbm [thread:$0]  %s32_s19, 256, %s127_s1, [#allocation4]  }
  0x23   :  { %88 = dma.done.wait [#allocation4], 256  }
  0x24   :  { %89 = vsyncadd [#allocation4], 4294967040 }
  0x25   :  { %38 = vsyncpa [#allocation3], 1 }
  0x26   :  { %39 = vsyncpa [#allocation4], 1 }

</bundles_post_ra>
